<compile_context>
chip_gen: v5e
topology: v5e:2x2
jax: 0.10.0
libtpu: 0.0.40
codegen_flags: <defaults>
</compile_context>

<pallas_src>
import jax
import jax.numpy as jnp
from jax.experimental import pallas as pl
from jax.experimental.pallas import tpu as pltpu

IN_F, H1, H2, OUT_F = 8, 200, 100, 1
H1P, H2P = 256, 128          # hidden feature dims padded to multiples of 128 lanes
BN_EPS = 1e-5


def _round_up(n, m):
    return ((n + m - 1) // m) * m


def mlp_kernel(xt_ref, w1t_ref, b1_ref, w2t_ref, b2_ref, w3_ref, b3_ref, o_ref):
    """One batch tile, fully transposed: batch rows live on the 128-lane axis.

    BN1/BN2 (eval) are pre-folded into (w2,b2)/(w3,b3); Dropout is identity.
    bf16 matmul operands, f32 accumulation and f32 elementwise math.
    """
    # layer1: h1^T = W1^T @ x^T -> (H1P, TB); bias + ReLU in f32.
    h1 = jnp.dot(w1t_ref[...], xt_ref[...], preferred_element_type=jnp.float32)
    h1 = jnp.maximum(h1 + b1_ref[...], 0.0)

    # layer2 (BN1 folded): h2^T = W2'^T @ h1^T -> (H2P, TB).
    h2 = jnp.dot(w2t_ref[...], h1.astype(jnp.bfloat16),
                 preferred_element_type=jnp.float32)
    h2 = jnp.maximum(h2 + b2_ref[...], 0.0)

    # layer3 (BN2 folded): y^T = w3' @ h2^T -> (1, TB), lane-dense store.
    y = jnp.dot(w3_ref[...], h2.astype(jnp.bfloat16),
                preferred_element_type=jnp.float32)
    o_ref[...] = y + b3_ref[...]


def mymodel_forward(x, kernel_params, *, tb=4096):
    """x: [B, 8] float32.  Returns [B, 1] float32 (eval-mode MyModel forward)."""
    w1t, b1, w2t, b2, w3r, b3 = kernel_params
    B, f_in = x.shape
    assert f_in == IN_F

    # Batch tile: multiple of 128 (lane-dense output, no masked vst.msk), and at
    # least 2 grid steps so both v7x TensorCores get work even for small batches.
    tb = max(128, (tb // 128) * 128)
    tb = min(tb, _round_up(pl.cdiv(B, 2), 128))
    n_tiles = max(2, pl.cdiv(B, tb))
    b_pad = n_tiles * tb

    # Stream x transposed: (8, b_pad) with batch on the lane axis end-to-end.
    xt = jnp.pad(x, ((0, b_pad - B), (0, 0))).T.astype(jnp.bfloat16)

    const = lambda shape: pl.BlockSpec(shape, lambda i: (0,) * len(shape))
    out = pl.pallas_call(
        mlp_kernel,
        out_shape=jax.ShapeDtypeStruct((1, b_pad), jnp.float32),
        grid=(n_tiles,),
        in_specs=[
            pl.BlockSpec((IN_F, tb), lambda i: (0, i)),   # x^T streamed over batch
            const((H1P, IN_F)), const((H1P, 1)),          # W1^T (bf16), b1 (f32 col)
            const((H2P, H1P)), const((H2P, 1)),           # W2'^T (BN1 folded), b2'
            const((1, H2P)), const((1, 1)),               # w3' row (BN2 folded), b3'
        ],
        out_specs=pl.BlockSpec((1, tb), lambda i: (0, i)),
        compiler_params=pltpu.CompilerParams(
            dimension_semantics=("parallel",),            # shards batch over v7x TCs
            vmem_limit_bytes=32 * 1024 * 1024),           # safe on v5e/v6e/v7x
    )(xt, w1t, b1, w2t, b2, w3r, b3)

    return out[0, :B].reshape(B, OUT_F)


def init_raw_params(key):
    """Raw parameters mirroring the PyTorch module (weights stored as [in, out])."""
    ks = jax.random.split(key, 14)

    def linear(kw, kb, fan_in, fan_out):
        bound = 1.0 / jnp.sqrt(jnp.float32(fan_in))
        w = jax.random.uniform(kw, (fan_in, fan_out), jnp.float32, -bound, bound)
        b = jax.random.uniform(kb, (fan_out,), jnp.float32, -bound, bound)
        return w, b

    def bn(kg, kb, km, kv, n):
        gamma = 1.0 + 0.1 * jax.random.normal(kg, (n,), jnp.float32)
        beta = 0.1 * jax.random.normal(kb, (n,), jnp.float32)
        mean = 0.1 * jax.random.normal(km, (n,), jnp.float32)
        var = jax.random.uniform(kv, (n,), jnp.float32, 0.5, 1.5)
        return gamma, beta, mean, var

    w1, b1 = linear(ks[0], ks[1], IN_F, H1)
    w2, b2 = linear(ks[2], ks[3], H1, H2)
    w3, b3 = linear(ks[4], ks[5], H2, OUT_F)
    bn1 = bn(ks[6], ks[7], ks[8], ks[9], H1)
    bn2 = bn(ks[10], ks[11], ks[12], ks[13], H2)
    return dict(w1=w1, b1=b1, w2=w2, b2=b2, w3=w3, b3=b3, bn1=bn1, bn2=bn2)


def pack_kernel_params(raw):
    """Fold eval-mode BN into the following Linear, zero-pad feature dims to lane
    multiples, transpose for the batch-on-lanes layout, and cast matmul operands
    to bf16 (biases stay f32)."""
    w1, b1 = raw["w1"], raw["b1"]
    w2, b2 = raw["w2"], raw["b2"]
    w3, b3 = raw["w3"], raw["b3"]
    g1, be1, m1, v1 = raw["bn1"]
    g2, be2, m2, v2 = raw["bn2"]

    s1 = g1 / jnp.sqrt(v1 + BN_EPS)
    t1 = be1 - m1 * s1
    s2 = g2 / jnp.sqrt(v2 + BN_EPS)
    t2 = be2 - m2 * s2

    # BN1(relu1) @ W2 + b2 == relu1 @ (s1[:,None]*W2) + (b2 + t1@W2); same for BN2/W3.
    w2f = w2 * s1[:, None]
    b2f = b2 + t1 @ w2
    w3f = w3 * s2[:, None]
    b3f = b3 + t2 @ w3

    pad = lambda a, r, c: jnp.pad(a, ((0, r - a.shape[0]), (0, c - a.shape[1])))

    w1t = pad(w1, IN_F, H1P).T.astype(jnp.bfloat16)      # (256, 8)
    b1p = pad(b1[:, None], H1P, 1)                       # (256, 1) f32
    w2t = pad(w2f, H1P, H2P).T.astype(jnp.bfloat16)      # (128, 256)
    b2p = pad(b2f[:, None], H2P, 1)                      # (128, 1) f32
    w3r = pad(w3f.T, 1, H2P).astype(jnp.bfloat16)        # (1, 128) row vector
    b3p = b3f.reshape(1, 1)                              # (1, 1) f32
    return (w1t, b1p, w2t, b2p, w3r, b3p)


def reference_forward(x, raw):
    """Plain-JAX f32 eval-mode forward mirroring MyModel exactly (BN unfolded)."""
    w1, b1 = raw["w1"], raw["b1"]
    w2, b2 = raw["w2"], raw["b2"]
    w3, b3 = raw["w3"], raw["b3"]
    g1, be1, m1, v1 = raw["bn1"]
    g2, be2, m2, v2 = raw["bn2"]
    h1 = jnp.maximum(x @ w1 + b1, 0.0)
    h1 = (h1 - m1) / jnp.sqrt(v1 + BN_EPS) * g1 + be1   # dropout1: identity (eval)
    h2 = jnp.maximum(h1 @ w2 + b2, 0.0)
    h2 = (h2 - m2) / jnp.sqrt(v2 + BN_EPS) * g2 + be2   # dropout2: identity (eval)
    return h2 @ w3 + b3


def reference_forward_folded(x, kp):
    """Same folded / bf16-operand / f32-accumulate / transposed math as the kernel."""
    w1t, b1, w2t, b2, w3r, b3 = kp
    xt = x.T.astype(jnp.bfloat16)
    h1 = jnp.maximum(
        jnp.dot(w1t, xt, preferred_element_type=jnp.float32) + b1, 0.0)
    h2 = jnp.maximum(
        jnp.dot(w2t, h1.astype(jnp.bfloat16),
                preferred_element_type=jnp.float32) + b2, 0.0)
    y = jnp.dot(w3r, h2.astype(jnp.bfloat16),
                preferred_element_type=jnp.float32) + b3
    return y.T


if __name__ == "__main__":
    key = jax.random.PRNGKey(0)
    kx, kp = jax.random.split(key)
    raw = init_raw_params(kp)
    kparams = pack_kernel_params(raw)

    # Small batch (forced 2-tile path) and a larger non-multiple batch (2 tiles + padding).
    for B in (16, 1000):
        x = jax.random.normal(jax.random.fold_in(kx, B), (B, IN_F), jnp.float32)

        y = mymodel_forward(x, kparams, tb=4096)
        jax.block_until_ready(y)
        assert y.shape == (B, OUT_F)

        # Tight check against the identically-quantized folded reference.
        y_fold = reference_forward_folded(x, kparams)
        assert jnp.allclose(y, y_fold, atol=1e-2, rtol=1e-2), \
            float(jnp.max(jnp.abs(y - y_fold)))

        # Loose check against the exact f32, unfolded module math (bf16 operand error).
        y_ref = reference_forward(x, raw)
        assert jnp.allclose(y, y_ref, atol=3e-2, rtol=3e-2), \
            float(jnp.max(jnp.abs(y - y_ref)))

    print("KERNEL_OK")
</pallas_src>

<mosaic_0001>
module attributes {stable_mosaic.version = 11 : i64} {
  func.func @mlp_kernel(%arg0: i32, %arg1: memref<8x128xbf16, #tpu.memory_space<vmem>>, %arg2: memref<256x8xbf16, #tpu.memory_space<vmem>>, %arg3: memref<256x1xf32, #tpu.memory_space<vmem>>, %arg4: memref<128x256xbf16, #tpu.memory_space<vmem>>, %arg5: memref<128x1xf32, #tpu.memory_space<vmem>>, %arg6: memref<1x128xbf16, #tpu.memory_space<vmem>>, %arg7: memref<1x1xf32, #tpu.memory_space<vmem>>, %arg8: memref<1x128xf32, #tpu.memory_space<vmem>>) attributes {dimension_semantics = [#tpu.dimension_semantics<parallel>], iteration_bounds = array<i64: 2>, scalar_prefetch = 0 : i64, scratch_operands = 0 : i64, tpu.core_type = #tpu.core_type<tc>, window_params = [{transform_indices = @transform_0, window_bounds = array<i64: 8, 128>}, {pipeline_mode = #tpu.pipeline_mode<synchronous>, transform_indices = @transform_1, window_bounds = array<i64: 256, 8>}, {pipeline_mode = #tpu.pipeline_mode<synchronous>, transform_indices = @transform_2, window_bounds = array<i64: 256, 1>}, {pipeline_mode = #tpu.pipeline_mode<synchronous>, transform_indices = @transform_3, window_bounds = array<i64: 128, 256>}, {pipeline_mode = #tpu.pipeline_mode<synchronous>, transform_indices = @transform_4, window_bounds = array<i64: 128, 1>}, {pipeline_mode = #tpu.pipeline_mode<synchronous>, transform_indices = @transform_5, window_bounds = array<i64: 1, 128>}, {pipeline_mode = #tpu.pipeline_mode<synchronous>, transform_indices = @transform_6, window_bounds = array<i64: 1, 1>}, {transform_indices = @transform_7, window_bounds = array<i64: 1, 128>}]} {
    %c0 = arith.constant 0 : index
    %c0_0 = arith.constant 0 : index
    %0 = vector.load %arg2[%c0, %c0_0] : memref<256x8xbf16, #tpu.memory_space<vmem>>, vector<256x8xbf16>
    %c0_1 = arith.constant 0 : index
    %c0_2 = arith.constant 0 : index
    %1 = vector.load %arg1[%c0_1, %c0_2] : memref<8x128xbf16, #tpu.memory_space<vmem>>, vector<8x128xbf16>
    %cst = arith.constant dense<0.000000e+00> : vector<256x128xf32>
    %2 = tpu.matmul %0, %1, %cst {dimension_numbers = #tpu.dot_dimension_numbers<[1], [0], [0], [1], [0, 0, 1, 1], [], []>} : vector<256x8xbf16>, vector<8x128xbf16>, vector<256x128xf32> -> vector<256x128xf32>
    %c0_3 = arith.constant 0 : index
    %c0_4 = arith.constant 0 : index
    %3 = vector.load %arg3[%c0_3, %c0_4] : memref<256x1xf32, #tpu.memory_space<vmem>>, vector<256x1xf32>
    %4 = vector.broadcast %3 : vector<256x1xf32> to vector<256x128xf32>
    %5 = arith.addf %2, %4 : vector<256x128xf32>
    %cst_5 = arith.constant 0.000000e+00 : f32
    %6 = vector.broadcast %cst_5 : f32 to vector<256x128xf32>
    %7 = arith.maximumf %5, %6 : vector<256x128xf32>
    %c0_6 = arith.constant 0 : index
    %c0_7 = arith.constant 0 : index
    %8 = vector.load %arg4[%c0_6, %c0_7] : memref<128x256xbf16, #tpu.memory_space<vmem>>, vector<128x256xbf16>
    %9 = arith.truncf %7 : vector<256x128xf32> to vector<256x128xbf16>
    %cst_8 = arith.constant dense<0.000000e+00> : vector<128x128xf32>
    %10 = tpu.matmul %8, %9, %cst_8 {dimension_numbers = #tpu.dot_dimension_numbers<[1], [0], [0], [1], [0, 0, 1, 1], [], []>} : vector<128x256xbf16>, vector<256x128xbf16>, vector<128x128xf32> -> vector<128x128xf32>
    %c0_9 = arith.constant 0 : index
    %c0_10 = arith.constant 0 : index
    %11 = vector.load %arg5[%c0_9, %c0_10] : memref<128x1xf32, #tpu.memory_space<vmem>>, vector<128x1xf32>
    %12 = vector.broadcast %11 : vector<128x1xf32> to vector<128x128xf32>
    %13 = arith.addf %10, %12 : vector<128x128xf32>
    %cst_11 = arith.constant 0.000000e+00 : f32
    %14 = vector.broadcast %cst_11 : f32 to vector<128x128xf32>
    %15 = arith.maximumf %13, %14 : vector<128x128xf32>
    %c0_12 = arith.constant 0 : index
    %c0_13 = arith.constant 0 : index
    %16 = vector.load %arg6[%c0_12, %c0_13] : memref<1x128xbf16, #tpu.memory_space<vmem>>, vector<1x128xbf16>
    %17 = arith.truncf %15 : vector<128x128xf32> to vector<128x128xbf16>
    %cst_14 = arith.constant dense<0.000000e+00> : vector<1x128xf32>
    %18 = tpu.matmul %16, %17, %cst_14 {dimension_numbers = #tpu.dot_dimension_numbers<[1], [0], [0], [1], [0, 0, 1, 1], [], []>} : vector<1x128xbf16>, vector<128x128xbf16>, vector<1x128xf32> -> vector<1x128xf32>
    %c0_15 = arith.constant 0 : index
    %c0_16 = arith.constant 0 : index
    %19 = vector.load %arg7[%c0_15, %c0_16] : memref<1x1xf32, #tpu.memory_space<vmem>>, vector<1x1xf32>
    %20 = vector.broadcast %19 : vector<1x1xf32> to vector<1x128xf32>
    %21 = arith.addf %18, %20 : vector<1x128xf32>
    %c0_17 = arith.constant 0 : index
    %c0_18 = arith.constant 0 : index
    %22 = vector.load %arg8[%c0_17, %c0_18] : memref<1x128xf32, #tpu.memory_space<vmem>>, vector<1x128xf32>
    tpu.vector_store %arg8[%c0_17, %c0_18], %21 {strides = array<i32>} : memref<1x128xf32, #tpu.memory_space<vmem>>, vector<1x128xf32>,
    return
  }
  func.func @transform_0(%arg0: i32) -> (i32, i32) {
    %c0_i32 = arith.constant 0 : i32
    %c0_i32_0 = arith.constant 0 : i32
    return %c0_i32, %arg0 : i32, i32
  }
  func.func @transform_1(%arg0: i32) -> (i32, i32) {
    %c0_i32 = arith.constant 0 : i32
    %c0_i32_0 = arith.constant 0 : i32
    %c0_i32_1 = arith.constant 0 : i32
    return %c0_i32, %c0_i32_0 : i32, i32
  }
  func.func @transform_2(%arg0: i32) -> (i32, i32) {
    %c0_i32 = arith.constant 0 : i32
    %c0_i32_0 = arith.constant 0 : i32
    %c0_i32_1 = arith.constant 0 : i32
    return %c0_i32, %c0_i32_0 : i32, i32
  }
  func.func @transform_3(%arg0: i32) -> (i32, i32) {
    %c0_i32 = arith.constant 0 : i32
    %c0_i32_0 = arith.constant 0 : i32
    %c0_i32_1 = arith.constant 0 : i32
    return %c0_i32, %c0_i32_0 : i32, i32
  }
  func.func @transform_4(%arg0: i32) -> (i32, i32) {
    %c0_i32 = arith.constant 0 : i32
    %c0_i32_0 = arith.constant 0 : i32
    %c0_i32_1 = arith.constant 0 : i32
    return %c0_i32, %c0_i32_0 : i32, i32
  }
  func.func @transform_5(%arg0: i32) -> (i32, i32) {
    %c0_i32 = arith.constant 0 : i32
    %c0_i32_0 = arith.constant 0 : i32
    %c0_i32_1 = arith.constant 0 : i32
    return %c0_i32, %c0_i32_0 : i32, i32
  }
  func.func @transform_6(%arg0: i32) -> (i32, i32) {
    %c0_i32 = arith.constant 0 : i32
    %c0_i32_0 = arith.constant 0 : i32
    %c0_i32_1 = arith.constant 0 : i32
    return %c0_i32, %c0_i32_0 : i32, i32
  }
  func.func @transform_7(%arg0: i32) -> (i32, i32) {
    %c0_i32 = arith.constant 0 : i32
    %c0_i32_0 = arith.constant 0 : i32
    return %c0_i32, %arg0 : i32, i32
  }
}

</mosaic_0001>

<bundles_post_ra>
// kernel: tpu_custom_call.1
= control target key start
LH: loop header
LB: loop body
LE: loop exit
PB: predicated region body
PF: predicated region fallthrough
CT: control target
= control target key end

     0   :  { %s2007_s0 = inlined_call_operand.vmem [shape: bf16[8,256], index: 0, kind: input, shape index: {}]   ;;  %s2008_s1 = inlined_call_operand.vmem [shape: bf16[256,8], index: 1, kind: input, shape index: {}]   ;;  %s2009_s2 = inlined_call_operand.vmem [shape: f32[256,1], index: 2, kind: input, shape index: {}]   ;;  %s2010_s3 = inlined_call_operand.vmem [shape: bf16[128,256], index: 3, kind: input, shape index: {}]   ;;  %s2011_s4 = inlined_call_operand.vmem [shape: f32[128,1], index: 4, kind: input, shape index: {}]   ;;  %s2012_s5 = inlined_call_operand.vmem [shape: bf16[1,128], index: 5, kind: input, shape index: {}]   ;;  %s2013_s6 = inlined_call_operand.<no memory space> [shape: f32[1,1], index: 6, kind: input, shape index: {}]   ;;  %s2014_s7 = inlined_call_operand.hbm [shape: f32[1,256], index: 7, kind: output, shape index: {}]  }
   0x1   :  { %v12_v0 = vstv %s2013_s6 }
   0x2   :  { %13 = vst [vmem:[#allocation2] sm:$0x1] %v12_v0 }
   0x3   :  { %14 = vsyncpa [#allocation4], 0 }
   0x4   :  { %16 = vsyncpa [#allocation4 + $0x1], 0  ;;  %s1510_s26 = smov 0   ;;  %s1512_s27 = smov 0  }
   0x5   :  { %s1514_s28 = smov 0   ;;  %s1516_s29 = smov 0  }
   0x6 LB: > { %s1531_s6 = sadd.s32 4294967295, %s1464_s29   ;;  %s1175_s30 = sadd.s32 4294967294, %s1464_s29   ;;  %s1464_s29 = sphi %s1516_s29, %s2020_s29   ;;  %s1460_s28 = sphi %s1514_s28, %s2019_s28   ;;  %s1456_s27 = sphi %s1512_s27, %s2018_s27   ;;  %s1452_s26 = sphi %s1510_s26, %s2017_s26  }
   0x7   : > { %s1535_s8 = sadd.s32 1, %s1464_s29   ;;  %s181_s9 = sadd.s32 1, %s1460_s28 }
   0x8   : > { %s178_s10 = ssub.s32 %s1464_s29, %s1535_s8  ;;  %p191_p0 = scmp.ne.s32.totalorder %s1460_s28, %s1456_s27 }
   0x9   : > { %p179_p1 = scmp.eq.s32.totalorder %s178_s10, 0  ;;  %p192_p2 = scmp.eq.s32.totalorder %s1531_s6, 1 }
   0xa   : > { %p197_p3 = scmp.ne.s32.totalorder %s1456_s27, %s1452_s26  ;;  %p198_p4 = scmp.eq.s32.totalorder %s1175_s30, 1 }
   0xb   : > { %s1546_s11 = scalar_select %p179_p1, %s1460_s28, %s181_s9  }
   0xc   : > { %p1548_p5 = por %p192_p2, %p191_p0  ;;  %p1552_p6 = por %p198_p4, %p197_p3 }
   0xd   : > { %p1178_p7 = scmp.ge.s32.totalorder %s1464_s29, 1  ;;  %p241_p8 = scmp.lt.s32.totalorder %s1464_s29, 3 }
   0xf   : > { %p242_p9 = pnand %p1178_p7, %p241_p8 }
  0x10   : > { %p271_p10 = scmp.lt.s32.totalorder (!%p242_p9), %s1531_s6, 1  ;;  %s269_s18 = sand.u32 (!%p242_p9), 1, %s1456_s27  }
  0x11   : > { %245 = sbr.rel (%p242_p9) target bundleno = 751 (0x2ef), region = 48  ;;  %s270_s22 = scalar_lea.vmem (!%p242_p9), [#allocation3], %s269_s18 }
  0x12   : > { %s1118_s23 = sshll.u32 (!%p242_p9), %s270_s22, 4  ;;  %s1108_s25 = scalar_lea.sflag (!%p242_p9), [#allocation4], %s269_s18  ;;  %s1119_s23 = int_to_ptr.vmem [resolvable:$true] %s1118_s23 }
  0x13   : > { %s1422_s14 = scalar_lea.hbm (!%p242_p9), %s2014_s7, 2 }
  0x16   : > { %v339_v1 = vld [vmem:[%s2009_s2 + $0xf0] sm:$0xff]  ;;  %v337_v2 = vld [vmem:[%s2009_s2 + $0xe0] sm:$0xff]  ;;  %v1466_v4 = vmov 0   ;;  %s272_s20 = scalar_select %p271_p10, %s1531_s6, 1  ;;  %vm630_vm0 = vcmask 1043456   ;;  %v340_v7 = vld [vmem:[%s2009_s2 + $0xf8] sm:$0xff] }
  0x17   : > { %v323_v3 = vld [vmem:[%s2009_s2 + $0x70] sm:$0xff]  ;;  %1401 = vset.pattern.permute.xlu2 %v1466_v4  ;;  %1400 = vset.pattern.permute.xlu1 %v1466_v4  ;;  %v338_v8 = vld [vmem:[%s2009_s2 + $0xe8] sm:$0xff]  ;;  %v324_v9 = vld [vmem:[%s2009_s2 + $0x78] sm:$0xff]  ;;  %vm581_vm1 = vcmask 64512  }
  0x18   : > { %1399 = vset.pattern.permute.xlu0 %v1466_v4  ;;  %483 = vperm.xlu2 %1401, %v337_v2   ;;  %s1179_s21 = sshll.u32 %s272_s20, 2  ;;  %v1326_v10 = vld [vmem:[%s2008_s1] sm:$0xff]  ;;  %v1336_v11 = vld [vmem:[%s2008_s1 + $0x50] sm:$0xff]  ;;  %v322_v13 = vld [vmem:[%s2009_s2 + $0x68] sm:$0xff] }
  0x19   : > { %493 = vperm.xlu0 %1399, %v339_v1   ;;  %413 = vperm.xlu1 %1400, %v323_v3   ;;  %s274_s24 = scalar_lea.vmem %s2007_s0, %s1179_s21  ;;  %v335_v12 = vld [vmem:[%s2009_s2 + $0xd0] sm:$0xff]  ;;  %v321_v14 = vld [vmem:[%s2009_s2 + $0x60] sm:$0xff]  ;;  %v336_v15 = vld [vmem:[%s2009_s2 + $0xd8] sm:$0xff]  ;;  %s1116_s21 = scalar_lea.hbm %s2014_s7, %s1531_s6 }
  0x1a   : > { %v308_v5 = vld [vmem:[%s274_s24] sm:$0xf]  ;;  %v320_v16 = vld [vmem:[%s2009_s2 + $0x58] sm:$0xff]  ;;  %v319_v17 = vld [vmem:[%s2009_s2 + $0x50] sm:$0xff]  ;;  %s1120_s24 = sshll.u32 %s1116_s21, 4  ;;  %s1121_s24 = int_to_ptr.hbm [resolvable:$true] %s1120_s24 }
  0x1b   : > { %v632_v6 = vsel %vm630_vm0, %v308_v5, 0  ;;  %v1327_v18 = vld [vmem:[%s2008_s1 + $0x8] sm:$0xff]  ;;  %v1337_v19 = vld [vmem:[%s2008_s1 + $0x58] sm:$0xff]  ;;  %v317_v20 = vld [vmem:[%s2009_s2 + $0x40] sm:$0xff]  ;;  %s1416_s30 = sshra.s32 %s1121_s24, 4  ;;  %s1417_s30 = int_to_ptr.hbm [resolvable:$true] %s1416_s30 }
  0x1c   : > { %641 = vmatpush.bf16.msra.mxu0 %v632_v6  ;;  %1358 = vmatpush.bf16.msra.mxu3 %v632_v6  ;;  %v333_v21 = vld [vmem:[%s2009_s2 + $0xc0] sm:$0xff]  ;;  %v334_v22 = vld [vmem:[%s2009_s2 + $0xc8] sm:$0xff]  ;;  %v331_v23 = vld [vmem:[%s2009_s2 + $0xb0] sm:$0xff]  ;;  %s1418_s9 = scalar_lea.hbm %s1417_s30, 1  ;;  %p1423_p0 = scmp.lt.s32.totalorder %s1417_s30, %s2014_s7 }
  0x1d   : > { %v332_v24 = vld [vmem:[%s2009_s2 + $0xb8] sm:$0xff]  ;;  %v318_v25 = vld [vmem:[%s2009_s2 + $0x48] sm:$0xff]  ;;  %v1328_v26 = vld [vmem:[%s2008_s1 + $0x10] sm:$0xff]  ;;  %p1419_p11 = scmp.ne.s32.totalorder %s1417_s30, %s1418_s9  ;;  %p1424_p1 = scmp.lt.s32.totalorder %s1422_s14, %s1418_s9 }
  0x1e   : > { %v1338_v27 = vld [vmem:[%s2008_s1 + $0x60] sm:$0xff]  ;;  %v316_v29 = vld [vmem:[%s2009_s2 + $0x38] sm:$0xff]  ;;  %v315_v30 = vld [vmem:[%s2009_s2 + $0x30] sm:$0xff] }
  0x1f   : > { %1244 = vmatmul.msk.bf16.vlgmr.msra.gmra.mxu0 %vm581_vm1, %v1326_v10  ;;  %1254 = vmatmul.msk.bf16.vlgmr.msra.gmra.mxu3 %vm581_vm1, %v1336_v11  ;;  %v329_v28 = vld [vmem:[%s2009_s2 + $0xa0] sm:$0xff]  ;;  %v330_v31 = vld [vmem:[%s2009_s2 + $0xa8] sm:$0xff]  ;;  %v1329_v34 = vld [vmem:[%s2008_s1 + $0x18] sm:$0xff]  ;;  %p1420_p12 = pnand %p1419_p11, %p1548_p5  ;;  %p1425_p2 = por %p1424_p1, %p1423_p0 }
  0x20   : > { %488 = vperm.xlu2 %1401, %v338_v8   ;;  %v314_v32 = vld [vmem:[%s2009_s2 + $0x28] sm:$0xff]  ;;  %v313_v33 = vld [vmem:[%s2009_s2 + $0x20] sm:$0xff]  ;;  %v311_v36 = vld [vmem:[%s2009_s2 + $0x10] sm:$0xff] }
  0x21   : > { %498 = vperm.xlu0 %1399, %v340_v7   ;;  %418 = vperm.xlu1 %1400, %v324_v9   ;;  %v1339_v35 = vld [vmem:[%s2008_s1 + $0x68] sm:$0xff]  ;;  %v327_v37 = vld [vmem:[%s2009_s2 + $0x90] sm:$0xff]  ;;  %v328_v38 = vld [vmem:[%s2009_s2 + $0x98] sm:$0xff]  ;;  %p1421_p13 = pneg %p1420_p12 }
  0x22   : > { %v325_v39 = vld [vmem:[%s2009_s2 + $0x80] sm:$0xff]  ;;  %v326_v40 = vld [vmem:[%s2009_s2 + $0x88] sm:$0xff]  ;;  %v312_v41 = vld [vmem:[%s2009_s2 + $0x18] sm:$0xff] }
  0x23   : > { %v1330_v42 = vld [vmem:[%s2008_s1 + $0x20] sm:$0xff]  ;;  %v1340_v43 = vld [vmem:[%s2008_s1 + $0x70] sm:$0xff]  ;;  %v310_v45 = vld [vmem:[%s2009_s2 + $0x8] sm:$0xff]  ;;  %p1426_p3 = pnand %p1425_p2, %p1421_p13 }
  0x24   : > { %v801_v44 = vld [vmem:[%s2011_s4 + $0x70] sm:$0xff]  ;;  %v309_v46 = vld [vmem:[%s2009_s2] sm:$0xff]  ;;  %v800_v48 = vld [vmem:[%s2011_s4 + $0x68] sm:$0xff] }
  0x25   : > { %v799_v47 = vld [vmem:[%s2011_s4 + $0x60] sm:$0xff]  ;;  %v802_v49 = vld [vmem:[%s2011_s4 + $0x78] sm:$0xff]  ;;  %v1331_v50 = vld [vmem:[%s2008_s1 + $0x28] sm:$0xff] }
  0x26   : > { %v1341_v51 = vld [vmem:[%s2008_s1 + $0x78] sm:$0xff]  ;;  %v795_v52 = vld [vmem:[%s2011_s4 + $0x40] sm:$0xff]  ;;  %v797_v54 = vld [vmem:[%s2011_s4 + $0x50] sm:$0xff] }
  0x27   : > { %v798_v53 = vld [vmem:[%s2011_s4 + $0x58] sm:$0xff]  ;;  %v793_v57 = vld [vmem:[%s2011_s4 + $0x30] sm:$0xff]  ;;  %v796_v58 = vld [vmem:[%s2011_s4 + $0x48] sm:$0xff] }
  0x28   : > { %473 = vperm.xlu2 %1401, %v335_v12   ;;  %v794_v55 = vld [vmem:[%s2011_s4 + $0x38] sm:$0xff]  ;;  %v1332_v59 = vld [vmem:[%s2008_s1 + $0x30] sm:$0xff]  ;;  %v792_v61 = vld [vmem:[%s2011_s4 + $0x28] sm:$0xff] }
  0x29   : > { %408 = vperm.xlu1 %1400, %v322_v13   ;;  %403 = vperm.xlu0 %1399, %v321_v14   ;;  %v789_v60 = vld [vmem:[%s2011_s4 + $0x10] sm:$0xff]  ;;  %v791_v62 = vld [vmem:[%s2011_s4 + $0x20] sm:$0xff]  ;;  %v788_v2 = vld [vmem:[%s2011_s4 + $0x8] sm:$0xff] }
  0x2a   : > { %v787_v3 = vld [vmem:[%s2011_s4] sm:$0xff]  ;;  %v790_v4 = vld [vmem:[%s2011_s4 + $0x18] sm:$0xff] }
  0x2b   : > { %v1333_v5 = vld [vmem:[%s2008_s1 + $0x38] sm:$0xff]  ;;  %v1086_v9 = vld [vmem:[#allocation2] sm:$0x1] }
  0x2c   : > { %v1334_v13 = vld [vmem:[%s2008_s1 + $0x40] sm:$0xff] }
  0x2f   : > { %1245 = vmatmul.msk.bf16.gmra.mxu0 %vm581_vm1, %v1327_v18  ;;  %1255 = vmatmul.msk.bf16.gmra.mxu3 %vm581_vm1, %v1337_v19 }
  0x30   : > { %398 = vperm.xlu2 %1401, %v320_v16  }
  0x31   : > { %478 = vperm.xlu0 %1399, %v336_v15   ;;  %393 = vperm.xlu1 %1400, %v319_v17  }
  0x38   : > { %383 = vperm.xlu2 %1401, %v317_v20  }
  0x39   : > { %463 = vperm.xlu0 %1399, %v333_v21   ;;  %468 = vperm.xlu1 %1400, %v334_v22  }
  0x3f   : > { %1246 = vmatmul.msk.bf16.gmra.mxu0 %vm581_vm1, %v1328_v26  ;;  %1256 = vmatmul.msk.bf16.gmra.mxu3 %vm581_vm1, %v1338_v27 }
  0x40   : > { %458 = vperm.xlu2 %1401, %v332_v24  }
  0x41   : > { %453 = vperm.xlu1 %1400, %v331_v23   ;;  %388 = vperm.xlu0 %1399, %v318_v25   ;;  %v1335_v23 = vld [vmem:[%s2008_s1 + $0x48] sm:$0xff] }
  0x48   : > { %443 = vperm.xlu2 %1401, %v329_v28  }
  0x49   : > { %378 = vperm.xlu1 %1400, %v316_v29   ;;  %373 = vperm.xlu0 %1399, %v315_v30  }
  0x4f   : > { %1247 = vmatmul.msk.bf16.gmra.mxu0 %vm581_vm1, %v1329_v34  ;;  %1257 = vmatmul.msk.bf16.gmra.mxu3 %vm581_vm1, %v1339_v35 }
  0x50   : > { %368 = vperm.xlu2 %1401, %v314_v32  }
  0x51   : > { %448 = vperm.xlu0 %1399, %v330_v31   ;;  %363 = vperm.xlu1 %1400, %v313_v33  }
  0x58   : > { %353 = vperm.xlu2 %1401, %v311_v36  }
  0x59   : > { %433 = vperm.xlu0 %1399, %v327_v37   ;;  %438 = vperm.xlu1 %1400, %v328_v38  }
  0x5f   : > { %1248 = vmatmul.msk.bf16.gmra.mxu0 %vm581_vm1, %v1330_v42  ;;  %1258 = vmatmul.msk.bf16.gmra.mxu3 %vm581_vm1, %v1340_v43 }
  0x60   : > { %428 = vperm.xlu2 %1401, %v326_v40  }
  0x61   : > { %423 = vperm.xlu1 %1400, %v325_v39   ;;  %358 = vperm.xlu0 %1399, %v312_v41  }
  0x68   : > { %875 = vperm.xlu2 %1401, %v801_v44  }
  0x69   : > { %348 = vperm.xlu1 %1400, %v310_v45   ;;  %343 = vperm.xlu0 %1399, %v309_v46  }
  0x6f   : > { %1249 = vmatmul.msk.bf16.gmra.mxu0 %vm581_vm1, %v1331_v50  ;;  %1259 = vmatmul.msk.bf16.gmra.mxu3 %vm581_vm1, %v1341_v51 }
  0x70   : > { %870 = vperm.xlu2 %1401, %v800_v48  }
  0x71   : > { %865 = vperm.xlu1 %1400, %v799_v47   ;;  %880 = vperm.xlu0 %1399, %v802_v49  }
  0x72   : > { %v1731_v56 = vpop.permute.xlu2 %483 }
  0x78   : > { %845 = vperm.xlu2 %1401, %v795_v52  }
  0x79   : > { %860 = vperm.xlu1 %1400, %v798_v53   ;;  %855 = vperm.xlu0 %1399, %v797_v54  }
  0x7a   : > { %v1752_v63 = vpop.permute.xlu2 %488 }
  0x7f   : > { %1250 = vmatmul.msk.bf16.gmra.mxu0 %vm581_vm1, %v1332_v59 }
  0x80   : > { %840 = vperm.xlu2 %1401, %v794_v55  }
  0x81   : > { %835 = vperm.xlu1 %1400, %v793_v57   ;;  %850 = vperm.xlu0 %1399, %v796_v58  }
  0x82   : > { %v1770_v6 = vpop.permute.xlu2 %473 }
  0x88   : > { %815 = vperm.xlu2 %1401, %v789_v60  }
  0x89   : > { %830 = vperm.xlu1 %1400, %v792_v61   ;;  %825 = vperm.xlu0 %1399, %v791_v62  }
  0x8a   : > { %v1781_v12 = vpop.permute.xlu2 %398 }
  0x8b   : > { %v1754_v0 = vpop.permute.xlu0 %493  ;;  %v1756_v1 = vpop.permute.xlu1 %413 }
  0x8f   : > { %1251 = vmatmul.msk.bf16.gmra.mxu0 %vm581_vm1, %v1333_v5 }
  0x90   : > { %810 = vperm.xlu2 %1401, %v788_v2  }
  0x91   : > { %805 = vperm.xlu1 %1400, %v787_v3   ;;  %820 = vperm.xlu0 %1399, %v790_v4  }
  0x92   : > { %v1793_v18 = vpop.permute.xlu2 %383 }
  0x93   : > { %v1773_v7 = vpop.permute.xlu0 %498  ;;  %v1775_v8 = vpop.permute.xlu1 %418 }
  0x99   : > { %1089 = vperm.xlu0 %1399, %v1086_v9  }
  0x9a   : > { %v459_v25 = vpop.permute.xlu2 %458 }
  0x9b   : > { %v1777_v10 = vpop.permute.xlu1 %408  ;;  %v1779_v11 = vpop.permute.xlu0 %403 }
  0x9c   : > { %v1786_v14 = vpop.f32.mrf.mxu0 }
  0x9f   : > { %1252 = vmatmul.msk.bf16.gmra.mxu0 %vm581_vm1, %v1334_v13 }
  0xa2   : > { %v693_v17 = vpop.f32.mrf.mxu3  ;;  %v444_v30 = vpop.permute.xlu2 %443 }
  0xa3   : > { %v1789_v15 = vpop.permute.xlu0 %478  ;;  %v1791_v16 = vpop.permute.xlu1 %393  ;;  %v694_v38 = vadd.f32 %v693_v17, %v444_v30 }
  0xa4   : > { %v645_v19 = vpop.f32.mrf.mxu0 }
  0xa5   : > { %v743_v43 = vmax.f32 %v694_v38, 0.0 }
  0xaa   : > { %v695_v22 = vpop.f32.mrf.mxu3  ;;  %v369_v45 = vpop.permute.xlu2 %368 }
  0xab   : > { %v1795_v20 = vpop.permute.xlu0 %463  ;;  %v1797_v21 = vpop.permute.xlu1 %468 }
  0xac   : > { %v648_v24 = vpop.f32.mrf.mxu0 }
  0xaf   : > { %1253 = vmatmul.msk.bf16.gmra.mxu0 %vm581_vm1, %v1335_v23 }
  0xb2   : > { %v698_v28 = vpop.f32.mrf.mxu3  ;;  %v354_v59 = vpop.permute.xlu2 %353 }
  0xb3   : > { %v454_v26 = vpop.permute.xlu1 %453  ;;  %v1803_v27 = vpop.permute.xlu0 %388  ;;  %v649_v61 = vadd.f32 %v648_v24, %v354_v59 }
  0xb4   : > { %v650_v29 = vpop.f32.mrf.mxu0  ;;  %v699_v31 = vadd.f32 %v698_v28, %v454_v26 }
  0xb5   : > { %v725_v5 = vmax.f32 %v649_v61, 0.0 }
  0xb6   : > { %v745_v35 = vmax.f32 %v699_v31, 0.0 }
  0xba   : > { %v700_v34 = vpop.f32.mrf.mxu3 }
  0xbb   : > { %v379_v32 = vpop.permute.xlu1 %378  ;;  %v374_v33 = vpop.permute.xlu0 %373  ;;  %v701_v36 = vadd.f32 %v700_v34, %v459_v25 }
  0xbc   : > { %v653_v37 = vpop.f32.mrf.mxu0 }
  0xbd   : > { %v746_v39 = vmax.f32 %v701_v36, 0.0 }
  0xbf   : > { %v1805_v40 = vpack.c.bf16 %v746_v39, %v745_v35 }
  0xc2   : > { %v703_v46 = vpop.f32.mrf.mxu3 }
  0xc3   : > { %v449_v41 = vpop.permute.xlu0 %448  ;;  %v364_v42 = vpop.permute.xlu1 %363 }
  0xc4   : > { %v696_v44 = vadd.f32 %v695_v22, %v449_v41  ;;  %v654_v48 = vadd.f32 %v653_v37, %v364_v42  ;;  %v655_v49 = vpop.f32.mrf.mxu0 }
  0xc5   : > { %v656_v50 = vadd.f32 %v655_v49, %v369_v45 }
  0xc6   : > { %v744_v47 = vmax.f32 %v696_v44, 0.0  ;;  %v727_v52 = vmax.f32 %v654_v48, 0.0 }
  0xc7   : > { %v728_v53 = vmax.f32 %v656_v50, 0.0 }
  0xc8   : > { %v1807_v51 = vpack.c.bf16 %v744_v47, %v743_v43 }
  0xc9   : > { %v1813_v57 = vpack.c.bf16 %v728_v53, %v727_v52 }
  0xca   : > { %v705_v58 = vpop.f32.mrf.mxu3 }
  0xcb   : > { %v1809_v54 = vpop.permute.xlu0 %433  ;;  %v1811_v55 = vpop.permute.xlu1 %438 }
  0xcc   : > { %v658_v60 = vpop.f32.mrf.mxu0 }
  0xcd   : > { %v659_v9 = vadd.f32 %v658_v60, %v374_v33 }
  0xcf   : > { %v729_v25 = vmax.f32 %v659_v9, 0.0 }
  0xd2   : > { %v708_v4 = vpop.f32.mrf.mxu3 }
  0xd3   : > { %v1815_v62 = vpop.permute.xlu1 %423  ;;  %v359_v2 = vpop.permute.xlu0 %358  ;;  %v709_v52 = vadd.f32 %v708_v4, %v1770_v6 }
  0xd4   : > { %v651_v3 = vadd.f32 %v650_v29, %v359_v2  ;;  %v660_v17 = vpop.f32.mrf.mxu0  ;;  %v706_v2 = vadd.f32 %v705_v58, %v1797_v21 }
  0xd5   : > { %v661_v22 = vadd.f32 %v660_v17, %v379_v32 }
  0xd6   : > { %v726_v13 = vmax.f32 %v651_v3, 0.0  ;;  %v748_v9 = vmax.f32 %v706_v2, 0.0  ;;  %v1286_v2 = vld [vmem:[%s2010_s3 + $0x30] sm:$0xf] }
  0xd7   : > { %v730_v26 = vmax.f32 %v661_v22, 0.0 }
  0xd8   : > { %v1817_v23 = vpack.c.bf16 %v726_v13, %v725_v5 }
  0xd9   : > { %v1820_v24 = vpack.c.bf16 %v730_v26, %v729_v25 }
  0xda   : > { %v710_v35 = vpop.f32.mrf.mxu3 }
  0xdb   : > { %v349_v28 = vpop.permute.xlu1 %348  ;;  %v344_v30 = vpop.permute.xlu0 %343  ;;  %v711_v53 = vadd.f32 %v710_v35, %v1789_v15 }
  0xdc   : > { %v646_v31 = vadd.f32 %v645_v19, %v349_v28  ;;  %v644_v34 = vadd.f32 %v1786_v14, %v344_v30  ;;  %v663_v37 = vpop.f32.mrf.mxu0 }
  0xdd   : > { %v750_v3 = vmax.f32 %v711_v53, 0.0  ;;  %v1347_v53 = vld [vmem:[%s2010_s3 + $0x24] sm:$0xf0] }
  0xde   : > { %v724_v36 = vmax.f32 %v646_v31, 0.0  ;;  %v723_v29 = vmax.f32 %v644_v34, 0.0 }
  0xe0   : > { %v1822_v38 = vpack.c.bf16 %v724_v36, %v723_v29 }
  0xe2   : > { %v713_v33 = vpop.f32.mrf.mxu3 }
  0xe3   : > { %v714_v19 = vadd.f32 %v713_v33, %v1731_v56  ;;  %v749_v56 = vmax.f32 %v709_v52, 0.0  ;;  %v429_v33 = vpop.permute.xlu2 %428  ;;  %v1278_v52 = vld [vmem:[%s2010_s3 + $0x20] sm:$0xf] }
  0xe4   : > { %v665_v39 = vpop.f32.mrf.mxu0 }
  0xe5   : > { %v751_v59 = vmax.f32 %v714_v19, 0.0  ;;  %v784_v13 = vpack.c.bf16 %v750_v3, %v749_v56  ;;  %v666_v31 = vadd.f32 %v665_v39, %v1803_v27  ;;  %v1349_v56 = vld [vmem:[%s2010_s3 + $0x34] sm:$0xf0] }
  0xe6   : > { %v1287_v3 = vor.u32 %v1349_v56, %v1286_v2 }
  0xea   : > { %v715_v32 = vpop.f32.mrf.mxu3 }
  0xeb   : > { %v716_v14 = vadd.f32 %v715_v32, %v1752_v63 }
  0xec   : > { %v668_v41 = vpop.f32.mrf.mxu0 }
  0xed   : > { %v752_v60 = vmax.f32 %v716_v14, 0.0  ;;  %v669_v30 = vadd.f32 %v668_v41, %v1791_v16 }
  0xef   : > { %v785_v63 = vpack.c.bf16 %v752_v60, %v751_v59  ;;  %v1279_v59 = vor.u32 %v1347_v53, %v1278_v52  ;;  %v1346_v60 = vld [vmem:[%s2010_s3 + $0x24] sm:$0xf] }
  0xf2   : > { %v718_v42 = vpop.f32.mrf.mxu3 }
  0xf3   : > { %v719_v44 = vadd.f32 %v718_v42, %v1754_v0  ;;  %v704_v0 = vadd.f32 %v703_v46, %v1795_v20 }
  0xf4   : > { %v670_v43 = vpop.f32.mrf.mxu0 }
  0xf5   : > { %v753_v49 = vmax.f32 %v719_v44, 0.0  ;;  %v671_v25 = vadd.f32 %v670_v43, %v1781_v12 }
  0xfa   : > { %v720_v45 = vpop.f32.mrf.mxu3 }
  0xfb   : > { %v721_v47 = vadd.f32 %v720_v45, %v1773_v7  ;;  %v747_v7 = vmax.f32 %v704_v0, 0.0  ;;  %v1342_v45 = vld [vmem:[%s2010_s3 + $0x4] sm:$0xf] }
  0xfc   : > { %v673_v48 = vpop.f32.mrf.mxu0 }
  0xfd   : > { %v754_v50 = vmax.f32 %v721_v47, 0.0  ;;  %v783_v6 = vpack.c.bf16 %v748_v9, %v747_v7  ;;  %v674_v46 = vadd.f32 %v673_v48, %v1779_v11  ;;  %v732_v11 = vmax.f32 %v666_v31, 0.0  ;;  %v1344_v48 = vld [vmem:[%s2010_s3 + $0x14] sm:$0xf]  ;;  %v1294_v9 = vld [vmem:[%s2010_s3 + $0x40] sm:$0xf] }
  0xfe   : > { %v1354_v31 = vld [vmem:[%s2010_s3 + $0x64] sm:$0xf] }
  0xff   : > { %v786_v61 = vpack.c.bf16 %v754_v50, %v753_v49  ;;  %v1272_v49 = vld [vmem:[%s2010_s3 + $0x18] sm:$0xf0] }
 0x100   : > { %v1275_v50 = vor.u32 %v1344_v48, %v1272_v49 }
 0x101   : > { %1012 = vmatpush.bf16.msra.mxu2 %v786_v61  ;;  %v1280_v61 = vld [vmem:[%s2010_s3 + $0x28] sm:$0xf0] }
 0x102   : > { %v1283_v0 = vor.u32 %v1346_v60, %v1280_v61 }
 0x104   : > { %v675_v5 = vpop.f32.mrf.mxu0 }
 0x105   : > { %1013 = vmatpush.bf16.msra.mxu2 %v785_v63  ;;  %v676_v20 = vadd.f32 %v675_v5, %v1777_v10  ;;  %v734_v10 = vmax.f32 %v671_v25, 0.0  ;;  %v1348_v63 = vld [vmem:[%s2010_s3 + $0x34] sm:$0xf]  ;;  %v1288_v5 = vld [vmem:[%s2010_s3 + $0x38] sm:$0xf0] }
 0x106   : > { %v1291_v7 = vor.u32 %v1348_v63, %v1288_v5 }
 0x107   : > { %v736_v26 = vmax.f32 %v676_v20, 0.0  ;;  %v1302_v20 = vld [vmem:[%s2010_s3 + $0x50] sm:$0xf] }
 0x109   : > { %1014 = vmatpush.bf16.msra.mxu2 %v784_v13  ;;  %v1351_v13 = vld [vmem:[%s2010_s3 + $0x44] sm:$0xf0] }
 0x10c   : > { %v678_v4 = vpop.f32.mrf.mxu0 }
 0x10d   : > { %1015 = vmatpush.bf16.msra.mxu2 %v783_v6  ;;  %v679_v15 = vadd.f32 %v678_v4, %v1756_v1  ;;  %v1295_v6 = vor.u32 %v1351_v13, %v1294_v9  ;;  %v1350_v4 = vld [vmem:[%s2010_s3 + $0x44] sm:$0xf] }
 0x10f   : > { %v737_v58 = vmax.f32 %v679_v15, 0.0  ;;  %v1296_v15 = vld [vmem:[%s2010_s3 + $0x48] sm:$0xf0] }
 0x111   : > { %1016 = vmatpush.bf16.msra.mxu2 %v1805_v40  ;;  %v735_v40 = vmax.f32 %v674_v46, 0.0 }
 0x113   : > { %v777_v34 = vpack.c.bf16 %v736_v26, %v735_v40  ;;  %v1310_v26 = vld [vmem:[%s2010_s3 + $0x60] sm:$0xf]  ;;  %v1927_v40 = vpop.permute.xlu2 %875 }
 0x114   : > { %v680_v17 = vpop.f32.mrf.mxu0 }
 0x115   : > { %v681_v21 = vadd.f32 %v680_v17, %v1775_v8  ;;  %1017 = vmatpush.bf16.msra.mxu2 %v1807_v51  ;;  %v664_v8 = vadd.f32 %v663_v37, %v1793_v18  ;;  %v733_v51 = vmax.f32 %v669_v30, 0.0  ;;  %v1262_v18 = vld [vmem:[%s2010_s3] sm:$0xf]  ;;  %v1343_v37 = vld [vmem:[%s2010_s3 + $0x4] sm:$0xf0]  ;;  %v1299_v17 = vor.u32 %v1350_v4, %v1296_v15 }
 0x116   : > { %v1263_v41 = vor.u32 %v1343_v37, %v1262_v18  ;;  %v1953_v37 = vpop.permute.xlu0 %880 }
 0x117   : > { %v738_v22 = vmax.f32 %v681_v21, 0.0  ;;  %v776_v35 = vpack.c.bf16 %v734_v10, %v733_v51  ;;  %v731_v36 = vmax.f32 %v664_v8, 0.0  ;;  %v1353_v21 = vld [vmem:[%s2010_s3 + $0x54] sm:$0xf0]  ;;  %v1312_v10 = vld [vmem:[%s2010_s3 + $0x68] sm:$0xf0] }
 0x118   : > { %v1303_v46 = vor.u32 %v1353_v21, %v1302_v20  ;;  %v1318_v51 = vld [vmem:[%s2010_s3 + $0x70] sm:$0xf] }
 0x119   : > { %v778_v28 = vpack.c.bf16 %v738_v22, %v737_v58  ;;  %v775_v29 = vpack.c.bf16 %v732_v11, %v731_v36  ;;  %v1352_v58 = vld [vmem:[%s2010_s3 + $0x54] sm:$0xf]  ;;  %v1304_v22 = vld [vmem:[%s2010_s3 + $0x58] sm:$0xf0]  ;;  %v1357_v11 = vld [vmem:[%s2010_s3 + $0x74] sm:$0xf0] }
 0x11a   : > { %v1307_v25 = vor.u32 %v1352_v58, %v1304_v22  ;;  %v1319_v36 = vor.u32 %v1357_v11, %v1318_v51 }
 0x11b   : > { %963 = vmatpush.bf16.msra.mxu1 %v778_v28  ;;  %v1355_v28 = vld [vmem:[%s2010_s3 + $0x64] sm:$0xf0]  ;;  %v1937_v8 = vpop.permute.xlu2 %870 }
 0x11c   : > { %v683_v1 = vpop.f32.mrf.mxu0  ;;  %v1311_v30 = vor.u32 %v1355_v28, %v1310_v26 }
 0x11f   : > { %964 = vmatpush.bf16.msra.mxu1 %v777_v34  ;;  %v1315_v34 = vor.u32 %v1354_v31, %v1312_v10 }
 0x123   : > { %965 = vmatpush.bf16.msra.mxu1 %v776_v35 }
 0x124   : > { %v685_v12 = vpop.f32.mrf.mxu0 }
 0x125   : > { %v686_v32 = vadd.f32 %v685_v12, %v429_v33  ;;  %v1356_v12 = vld [vmem:[%s2010_s3 + $0x74] sm:$0xf] }
 0x127   : > { %966 = vmatpush.bf16.msra.mxu1 %v775_v29  ;;  %v1320_v29 = vld [vmem:[%s2010_s3 + $0x78] sm:$0xf0] }
 0x12b   : > { %967 = vmatpush.bf16.msra.mxu1 %v1820_v24 }
 0x12c   : > { %v688_v16 = vpop.f32.mrf.mxu0 }
 0x12d   : > { %v689_v27 = vadd.f32 %v688_v16, %v1809_v54  ;;  %v846_v16 = vpop.permute.xlu2 %845 }
 0x12f   : > { %968 = vmatpush.bf16.msra.mxu1 %v1813_v57  ;;  %v684_v57 = vadd.f32 %v683_v1, %v1815_v62  ;;  %v741_v42 = vmax.f32 %v689_v27, 0.0  ;;  %v1270_v62 = vld [vmem:[%s2010_s3 + $0x10] sm:$0xf]  ;;  %v1929_v1 = vpop.permute.xlu1 %865  ;;  %v1323_v27 = vor.u32 %v1356_v12, %v1320_v29 }
 0x131   : > { %v739_v44 = vmax.f32 %v684_v57, 0.0 }
 0x133   : > { %969 = vmatpush.bf16.msra.mxu1 %v1817_v23  ;;  %v740_v23 = vmax.f32 %v686_v32, 0.0 }
 0x134   : > { %v690_v39 = vpop.f32.mrf.mxu0 }
 0x135   : > { %v691_v24 = vadd.f32 %v690_v39, %v1811_v55  ;;  %v1264_v55 = vld [vmem:[%s2010_s3 + $0x8] sm:$0xf0]  ;;  %v779_v19 = vpack.c.bf16 %v740_v23, %v739_v44  ;;  %v841_v33 = vpop.permute.xlu2 %840 }
 0x136   : > { %v1267_v14 = vor.u32 %v1342_v45, %v1264_v55 }
 0x137   : > { %v742_v54 = vmax.f32 %v691_v24, 0.0  ;;  %970 = vmatpush.bf16.msra.mxu1 %v1822_v38  ;;  %v1345_v38 = vld [vmem:[%s2010_s3 + $0x14] sm:$0xf0]  ;;  %v1945_v35 = vpop.permute.xlu1 %860  ;;  %v1955_v24 = vpop.permute.xlu0 %855 }
 0x138   : > { %v1271_v47 = vor.u32 %v1345_v38, %v1270_v62 }
 0x139   : > { %v780_v43 = vpack.c.bf16 %v742_v54, %v741_v42 }
 0x13a   : > { %971 = vmatmul.bf16.vlgmr.msra.gmra.mxu1 %v1263_v41 }
 0x13b   : > { %1018 = vmatpush.bf16.msra.mxu2 %v780_v43 }
 0x13d   : > { %v816_v57 = vpop.permute.xlu2 %815 }
 0x13f   : > { %1019 = vmatpush.bf16.msra.mxu2 %v779_v19  ;;  %v836_v18 = vpop.permute.xlu1 %835  ;;  %v1957_v44 = vpop.permute.xlu0 %850 }
 0x142   : > { %1020 = vmatmul.bf16.vlgmr.msra.gmra.mxu2 %v1267_v14 }
 0x145   : > { %v811_v55 = vpop.permute.xlu2 %810 }
 0x147   : > { %v831_v32 = vpop.permute.xlu1 %830  ;;  %v826_v49 = vpop.permute.xlu0 %825 }
 0x14a   : > { %976 = vmatmul.bf16.gmra.mxu1 %v1271_v47 }
 0x14f   : > { %v806_v42 = vpop.permute.xlu1 %805  ;;  %v821_v61 = vpop.permute.xlu0 %820 }
 0x152   : > { %1025 = vmatmul.bf16.gmra.mxu2 %v1275_v50 }
 0x15a   : > { %981 = vmatmul.bf16.gmra.mxu1 %v1279_v59 }
 0x162   : > { %1030 = vmatmul.bf16.gmra.mxu2 %v1283_v0 }
 0x16a   : > { %986 = vmatmul.bf16.gmra.mxu1 %v1287_v3 }
 0x172   : > { %1035 = vmatmul.bf16.gmra.mxu2 %v1291_v7 }
 0x17a   : > { %991 = vmatmul.bf16.gmra.mxu1 %v1295_v6 }
 0x182   : > { %1040 = vmatmul.bf16.gmra.mxu2 %v1299_v17 }
 0x18a   : > { %996 = vmatmul.bf16.gmra.mxu1 %v1303_v46 }
 0x192   : > { %1045 = vmatmul.bf16.gmra.mxu2 %v1307_v25 }
 0x19a   : > { %1001 = vmatmul.bf16.gmra.mxu1 %v1311_v30 }
 0x1a2   : > { %1050 = vmatmul.bf16.gmra.mxu2 %v1315_v34 }
 0x1aa   : > { %1006 = vmatmul.bf16.gmra.mxu1 %v1319_v36 }
 0x1b2   : > { %1055 = vmatmul.bf16.gmra.mxu2 %v1323_v27 }
 0x1b7   : > { %v972_v39 = vpop.f32.mrf.mxu1 }
 0x1b8   : > { %v973_v54 = vadd.f32 %v972_v39, %v806_v42 }
 0x1bf   : > { %v974_v41 = vpop.f32.mrf.mxu1 }
 0x1c0   : > { %v975_v19 = vadd.f32 %v974_v41, %v811_v55 }
 0x1c5   : > { %v1021_v23 = vpop.f32.mrf.mxu2 }
 0x1c6   : > { %v1022_v43 = vadd.f32 %v1021_v23, %v973_v54 }
 0x1c7   : > { %v977_v45 = vpop.f32.mrf.mxu1 }
 0x1c8   : > { %v1061_v47 = vmax.f32 %v1022_v43, 0.0  ;;  %v978_v52 = vadd.f32 %v977_v45, %v816_v57 }
 0x1cd   : > { %v1023_v14 = vpop.f32.mrf.mxu2 }
 0x1ce   : > { %v1024_v62 = vadd.f32 %v1023_v14, %v975_v19 }
 0x1cf   : > { %v979_v38 = vpop.f32.mrf.mxu1 }
 0x1d0   : > { %v1062_v48 = vmax.f32 %v1024_v62, 0.0  ;;  %v980_v0 = vadd.f32 %v979_v38, %v821_v61 }
 0x1d2   : > { %v1959_v50 = vpack.c.bf16 %v1062_v48, %v1061_v47 }
 0x1d5   : > { %v1026_v53 = vpop.f32.mrf.mxu2 }
 0x1d6   : > { %v1027_v59 = vadd.f32 %v1026_v53, %v978_v52 }
 0x1d7   : > { %v982_v60 = vpop.f32.mrf.mxu1 }
 0x1d8   : > { %v1063_v63 = vmax.f32 %v1027_v59, 0.0  ;;  %v983_v9 = vadd.f32 %v982_v60, %v826_v49 }
 0x1dd   : > { %v1028_v2 = vpop.f32.mrf.mxu2 }
 0x1de   : > { %v1029_v56 = vadd.f32 %v1028_v2, %v980_v0 }
 0x1df   : > { %v984_v3 = vpop.f32.mrf.mxu1 }
 0x1e0   : > { %v1064_v5 = vmax.f32 %v1029_v56, 0.0  ;;  %v985_v15 = vadd.f32 %v984_v3, %v831_v32 }
 0x1e2   : > { %v1961_v7 = vpack.c.bf16 %v1064_v5, %v1063_v63 }
 0x1e5   : > { %v1031_v13 = vpop.f32.mrf.mxu2 }
 0x1e6   : > { %v1032_v6 = vadd.f32 %v1031_v13, %v983_v9 }
 0x1e7   : > { %v987_v4 = vpop.f32.mrf.mxu1 }
 0x1e8   : > { %v1065_v46 = vmax.f32 %v1032_v6, 0.0  ;;  %v988_v25 = vadd.f32 %v987_v4, %v836_v18  ;;  %v1090_v4 = vpop.permute.xlu0 %1089 }
 0x1ed   : > { %v1033_v17 = vpop.f32.mrf.mxu2 }
 0x1ee   : > { %v1034_v20 = vadd.f32 %v1033_v17, %v985_v15  ;;  %v1092_v15 = vperm.slane %v1090_v4, 0 }
 0x1ef   : > { %v989_v21 = vpop.f32.mrf.mxu1 }
 0x1f0   : > { %v1066_v58 = vmax.f32 %v1034_v20, 0.0  ;;  %v990_v31 = vadd.f32 %v989_v21, %v841_v33 }
 0x1f2   : > { %v1080_v22 = vpack.c.bf16 %v1066_v58, %v1065_v46 }
 0x1f5   : > { %v1036_v26 = vpop.f32.mrf.mxu2 }
 0x1f6   : > { %v1037_v28 = vadd.f32 %v1036_v26, %v988_v25 }
 0x1f7   : > { %v992_v30 = vpop.f32.mrf.mxu1 }
 0x1f8   : > { %v1067_v11 = vmax.f32 %v1037_v28, 0.0  ;;  %v993_v29 = vadd.f32 %v992_v30, %v846_v16 }
 0x1fd   : > { %v1038_v10 = vpop.f32.mrf.mxu2 }
 0x1fe   : > { %v1039_v34 = vadd.f32 %v1038_v10, %v990_v31 }
 0x1ff   : > { %v994_v51 = vpop.f32.mrf.mxu1 }
 0x200   : > { %v1068_v36 = vmax.f32 %v1039_v34, 0.0 }
 0x202   : > { %v1081_v12 = vpack.c.bf16 %v1068_v36, %v1067_v11 }
 0x205   : > { %v1041_v27 = vpop.f32.mrf.mxu2 }
 0x206   : > { %v1042_v39 = vadd.f32 %v1041_v27, %v993_v29 }
 0x207   : > { %v997_v32 = vpop.f32.mrf.mxu1 }
 0x208   : > { %v998_v0 = vadd.f32 %v997_v32, %v1955_v24  ;;  %v1069_v6 = vmax.f32 %v1042_v39, 0.0 }
 0x20d   : > { %v1043_v41 = vpop.f32.mrf.mxu2 }
 0x20f   : > { %v999_v57 = vpop.f32.mrf.mxu1 }
 0x210   : > { %v1000_v53 = vadd.f32 %v999_v57, %v1945_v35 }
 0x215   : > { %v1046_v42 = vpop.f32.mrf.mxu2 }
 0x216   : > { %v1047_v3 = vadd.f32 %v1046_v42, %v998_v0 }
 0x217   : > { %v1002_v54 = vpop.f32.mrf.mxu1 }
 0x218   : > { %v1003_v48 = vadd.f32 %v1002_v54, %v1929_v1  ;;  %v1071_v9 = vmax.f32 %v1047_v3, 0.0 }
 0x21d   : > { %v1048_v23 = vpop.f32.mrf.mxu2 }
 0x21e   : > { %v1049_v2 = vadd.f32 %v1048_v23, %v1000_v53 }
 0x21f   : > { %v1004_v18 = vpop.f32.mrf.mxu1 }
 0x220   : > { %v1005_v62 = vadd.f32 %v1004_v18, %v1937_v8  ;;  %v995_v8 = vadd.f32 %v994_v51, %v1957_v44  ;;  %v1072_v5 = vmax.f32 %v1049_v2, 0.0  ;;  %v1077_v44 = vld [vmem:[%s2012_s5] sm:$0x1] }
 0x222   : > { %v1044_v63 = vadd.f32 %v1043_v41, %v995_v8  ;;  %v1083_v13 = vpack.c.bf16 %v1072_v5, %v1071_v9 }
 0x224   : > { %v1070_v35 = vmax.f32 %v1044_v63, 0.0 }
 0x225   : > { %v1051_v43 = vpop.f32.mrf.mxu2 }
 0x226   : > { %v1052_v59 = vadd.f32 %v1051_v43, %v1003_v48  ;;  %v1082_v24 = vpack.c.bf16 %v1070_v35, %v1069_v6 }
 0x227   : > { %v1007_v55 = vpop.f32.mrf.mxu1 }
 0x228   : > { %v1008_v14 = vadd.f32 %v1007_v55, %v1927_v40 }
 0x22d   : > { %v1053_v45 = vpop.f32.mrf.mxu2 }
 0x22e   : > { %v1054_v49 = vadd.f32 %v1053_v45, %v1005_v62 }
 0x22f   : > { %v1009_v19 = vpop.f32.mrf.mxu1 }
 0x230   : > { %v1010_v16 = vadd.f32 %v1009_v19, %v1953_v37  ;;  %v1074_v56 = vmax.f32 %v1054_v49, 0.0  ;;  %v1073_v37 = vmax.f32 %v1052_v59, 0.0 }
 0x232   : > { %v1084_v1 = vpack.c.bf16 %v1074_v56, %v1073_v37 }
 0x235   : > { %v1056_v33 = vpop.f32.mrf.mxu2 }
 0x236   : > { %v1057_v38 = vadd.f32 %v1056_v33, %v1008_v14 }
 0x238   : > { %v1075_v60 = vmax.f32 %v1057_v38, 0.0 }
 0x23d   : > { %v1058_v47 = vpop.f32.mrf.mxu2 }
 0x23e   : > { %v1059_v52 = vadd.f32 %v1058_v47, %v1010_v16 }
 0x240   : > { %v1076_v61 = vmax.f32 %v1059_v52, 0.0 }
 0x242   : > { %v1085_v40 = vpack.c.bf16 %v1076_v61, %v1075_v60 }
 0x244   : > { %1093 = vmatpush.bf16.msrb.mxu3 %v1085_v40 }
 0x248   : > { %1094 = vmatpush.bf16.msrb.mxu3 %v1084_v1 }
 0x24c   : > { %1095 = vmatpush.bf16.msrb.mxu3 %v1083_v13 }
 0x250   : > { %1096 = vmatpush.bf16.msrb.mxu3 %v1082_v24 }
 0x254   : > { %1097 = vmatpush.bf16.msrb.mxu3 %v1081_v12 }
 0x258   : > { %1098 = vmatpush.bf16.msrb.mxu3 %v1080_v22 }
 0x25c   : > { %1099 = vmatpush.bf16.msrb.mxu3 %v1961_v7 }
 0x260   : > { %1100 = vmatpush.bf16.msrb.mxu3 %v1959_v50 }
 0x263   : > { %1101 = vmatmul.bf16.vlgmr.msrb.gmra.mxu3 %v1077_v44 }
 0x2e6   : > { %v1102_v17 = vpop.f32.mrf.mxu3 }
 0x2e7   : > { %v1103_v7 = vadd.f32 %v1102_v17, %v1092_v15 }
 0x2e9   : > { %1106 = vst [vmem:[%s270_s22] sm:$0x1] %v1103_v7 }
 0x2ea   : > { %1429 = shalt.err (!%p1426_p3)
}
 0x2eb   : > { %1359 = dma.vmem_to_hbm [thread:$0]  (%p1548_p5), %s1119_s23, 16, %s1121_s24, %s1108_s25  }
 0x2ee   : > { %v1104_v50 = vpop.f32.mrf.mxu3 }
 0x2ef PF: > { %p1365_p4 = scmp.ge.s32.totalorder %s1464_s29, 2  ;;  %s1132_s17 = sand.u32 1, %s1452_s26  }
 0x2f0   : > { %s1133_s18 = scalar_lea.sflag [#allocation4], %s1132_s17 }
 0x2f1   : > { %p1362_p7 = pnand %p1365_p4, %p1552_p6 }
 0x2f3   : > { %p1363_p8 = pneg %p1362_p7 }
 0x2f5   : > { %1447 = dma.done.wait (%p1363_p8), %s1133_s18, 16  }
 0x2f6   : > { %1449 = vsyncadd (%p1363_p8), %s1133_s18, 4294967280  ;;  %p19_p9 = scmp.ge.s32.totalorder %s1535_s8, 4   ;;  %s2017_s26 = smov %s1456_s27 }
 0x2f7   : > { %s2018_s27 = smov %s1460_s28  ;;  %s2019_s28 = smov %s1546_s11 }
 0x2f8   : > { %s2020_s29 = smov %s1535_s8  ;;  %21 = sbr.rel (!%p19_p9) target bundleno = 6 (0x6), region = 83 }
 0x2fd   :  { %1138 = vsyncpa [#allocation4], 1 }
 0x2fe   :  { %1140 = vsyncpa [#allocation4 + $0x1], 1 }

</bundles_post_ra>
